<compile_context>
chip_gen: v7x
topology: tpu7x:2x2x1
jax: 0.10.0
libtpu: 0.0.40
codegen_flags: <defaults>
</compile_context>

<pallas_src>
import numpy as np
import jax
import jax.numpy as jnp
from jax.experimental import pallas as pl
from jax.experimental.pallas import tpu as pltpu

N_BITS = 3                 # AddressLayer.n_bits
A = 2 ** N_BITS            # number of "addresses" (rows of b_0 / b_1)


def _bit_constants(dtype):
    """Trace-time (N_BITS, A) weight matrices b_0.T and b_1.T as small device constants."""
    idx = np.arange(A, dtype=np.int64).reshape(-1, 1)
    mul = (2 ** (N_BITS - 1 - np.arange(N_BITS, dtype=np.int64))).reshape(1, -1)
    bits = (idx // mul) % 2                         # (A, D) MSB-first, {0, 1}
    b0 = bits.astype(np.float64)                    # b.float()          -> {0, 1}
    b1 = (~bits).astype(np.float64)                 # (~b).float() = -b-1 -> {-1, -2}
    # Transposed so the kernel computes x @ W  (== a @ b.T of the module).
    return (jnp.asarray(b0.T, dtype=dtype), jnp.asarray(b1.T, dtype=dtype))


def _address_kernel(b0t_ref, b1t_ref, a0_ref, a1_ref, out_ref):
    # a0/a1 blocks: (TB, 3); b0t/b1t: (3, 8) constant weights; out block: (TB, 8).
    acc = jnp.dot(a0_ref[...], b0t_ref[...], preferred_element_type=jnp.float32)
    acc = acc + jnp.dot(a1_ref[...], b1t_ref[...], preferred_element_type=jnp.float32)
    out_ref[...] = acc.astype(out_ref.dtype)


def _choose_block_b(batch, in_itemsize, out_itemsize, vmem_budget_bytes=24 << 20):
    """Largest B tile that keeps the double-buffered, lane-padded footprint in budget."""
    # Each (TB, 3)/(TB, 8) block row occupies a full 128-lane tile in VMEM.
    per_row = 2 * (2 * 128 * in_itemsize + 128 * out_itemsize)   # 2 bufs * (2 in + 1 out)
    tb = int(vmem_budget_bytes // per_row)
    if tb >= batch:
        return batch                       # full-extent block is always legal
    return max(8, (tb // 8) * 8)           # sublane (8) constraint


def address_layer_forward(a_0: jax.Array, a_1: jax.Array, *,
                          block_b: int | None = None,
                          out_dtype=jnp.float32) -> jax.Array:
    """Pallas implementation of AddressLayer.forward; returns attn of shape (B, A)."""
    assert a_0.ndim == 2 and a_0.shape == a_1.shape and a_0.shape[1] == N_BITS
    assert a_0.dtype == a_1.dtype
    batch = a_0.shape[0]
    in_itemsize = jnp.dtype(a_0.dtype).itemsize
    out_itemsize = jnp.dtype(out_dtype).itemsize

    if block_b is None:
        tb = _choose_block_b(batch, in_itemsize, out_itemsize)
    else:
        tb = int(block_b)
        if tb != batch:                    # round to satisfy the (8, 128) constraint
            tb = max(8, (tb // 8) * 8)
    tb = min(tb, batch)

    b0t, b1t = _bit_constants(a_0.dtype)   # (N_BITS, A) each; exact in bf16 too

    grid = (pl.cdiv(batch, tb),)

    # Double-buffered footprint + headroom; capped well below v7x's 64 MiB/TC.
    per_row = 2 * (2 * 128 * in_itemsize + 128 * out_itemsize)
    vmem_limit = int(min(per_row * tb + (8 << 20), 48 << 20))

    return pl.pallas_call(
        _address_kernel,
        out_shape=jax.ShapeDtypeStruct((batch, A), out_dtype),
        grid=grid,
        in_specs=[
            pl.BlockSpec((N_BITS, A), lambda i: (0, 0)),     # b_0.T, fetched once
            pl.BlockSpec((N_BITS, A), lambda i: (0, 0)),     # b_1.T, fetched once
            pl.BlockSpec((tb, N_BITS), lambda i: (i, 0)),
            pl.BlockSpec((tb, N_BITS), lambda i: (i, 0)),
        ],
        out_specs=pl.BlockSpec((tb, A), lambda i: (i, 0)),
        compiler_params=pltpu.CompilerParams(
            dimension_semantics=("parallel",),
            vmem_limit_bytes=vmem_limit,
        ),
    )(b0t, b1t, a_0, a_1)


def _reference_forward(a_0, a_1):
    idx = jnp.arange(A, dtype=jnp.int32)[:, None]
    mul = (2 ** (N_BITS - 1 - jnp.arange(N_BITS, dtype=jnp.int32)))[None, :]
    bits = (idx // mul) % 2
    b_0 = bits.astype(jnp.float32)           # b.float()
    b_1 = (-bits - 1).astype(jnp.float32)    # (~b).float() on int64 -> {-1, -2}
    return a_0 @ b_0.T + a_1 @ b_1.T


if __name__ == "__main__":
    key = jax.random.PRNGKey(0)
    k0, k1, k2, k3 = jax.random.split(key, 4)

    # Small case: one full-extent block (batch = 8 rows on the sublane axis).
    B1 = 8
    a0_s = jax.random.normal(k0, (B1, N_BITS), dtype=jnp.float32)
    a1_s = jax.random.normal(k1, (B1, N_BITS), dtype=jnp.float32)
    out_s = jax.block_until_ready(address_layer_forward(a0_s, a1_s))
    assert out_s.shape == (B1, A)
    assert jnp.allclose(out_s, _reference_forward(a0_s, a1_s), atol=1e-5, rtol=1e-5), \
        "mismatch (small)"

    # Tiled case exercising the pipelined grid (4 B-tiles of 16 rows).
    B2 = 64
    a0_l = jax.random.normal(k2, (B2, N_BITS), dtype=jnp.float32)
    a1_l = jax.random.normal(k3, (B2, N_BITS), dtype=jnp.float32)
    out_l = jax.block_until_ready(address_layer_forward(a0_l, a1_l, block_b=16))
    assert out_l.shape == (B2, A)
    assert jnp.allclose(out_l, _reference_forward(a0_l, a1_l), atol=1e-5, rtol=1e-5), \
        "mismatch (tiled)"

    print("KERNEL_OK")
</pallas_src>

<mosaic_0001>
module attributes {stable_mosaic.version = 11 : i64} {
  func.func @_address_kernel(%arg0: i32, %arg1: memref<3x8xf32, #tpu.memory_space<vmem>>, %arg2: memref<3x8xf32, #tpu.memory_space<vmem>>, %arg3: memref<8x3xf32, #tpu.memory_space<vmem>>, %arg4: memref<8x3xf32, #tpu.memory_space<vmem>>, %arg5: memref<8x8xf32, #tpu.memory_space<vmem>>) attributes {dimension_semantics = [#tpu.dimension_semantics<parallel>], iteration_bounds = array<i64: 1>, scalar_prefetch = 0 : i64, scratch_operands = 0 : i64, tpu.core_type = #tpu.core_type<tc>, window_params = [{pipeline_mode = #tpu.pipeline_mode<synchronous>, transform_indices = @transform_0, window_bounds = array<i64: 3, 8>}, {pipeline_mode = #tpu.pipeline_mode<synchronous>, transform_indices = @transform_1, window_bounds = array<i64: 3, 8>}, {transform_indices = @transform_2, window_bounds = array<i64: 8, 3>}, {transform_indices = @transform_3, window_bounds = array<i64: 8, 3>}, {transform_indices = @transform_4, window_bounds = array<i64: 8, 8>}]} {
    %c0 = arith.constant 0 : index
    %c0_0 = arith.constant 0 : index
    %0 = vector.load %arg3[%c0, %c0_0] : memref<8x3xf32, #tpu.memory_space<vmem>>, vector<8x3xf32>
    %c0_1 = arith.constant 0 : index
    %c0_2 = arith.constant 0 : index
    %1 = vector.load %arg1[%c0_1, %c0_2] : memref<3x8xf32, #tpu.memory_space<vmem>>, vector<3x8xf32>
    %cst = arith.constant dense<0.000000e+00> : vector<8x8xf32>
    %2 = tpu.matmul %0, %1, %cst {dimension_numbers = #tpu.dot_dimension_numbers<[1], [0], [0], [1], [0, 0, 1, 1], [], []>} : vector<8x3xf32>, vector<3x8xf32>, vector<8x8xf32> -> vector<8x8xf32>
    %c0_3 = arith.constant 0 : index
    %c0_4 = arith.constant 0 : index
    %3 = vector.load %arg4[%c0_3, %c0_4] : memref<8x3xf32, #tpu.memory_space<vmem>>, vector<8x3xf32>
    %c0_5 = arith.constant 0 : index
    %c0_6 = arith.constant 0 : index
    %4 = vector.load %arg2[%c0_5, %c0_6] : memref<3x8xf32, #tpu.memory_space<vmem>>, vector<3x8xf32>
    %cst_7 = arith.constant dense<0.000000e+00> : vector<8x8xf32>
    %5 = tpu.matmul %3, %4, %cst_7 {dimension_numbers = #tpu.dot_dimension_numbers<[1], [0], [0], [1], [0, 0, 1, 1], [], []>} : vector<8x3xf32>, vector<3x8xf32>, vector<8x8xf32> -> vector<8x8xf32>
    %6 = arith.addf %2, %5 : vector<8x8xf32>
    %c0_8 = arith.constant 0 : index
    %c0_9 = arith.constant 0 : index
    %7 = vector.load %arg5[%c0_8, %c0_9] : memref<8x8xf32, #tpu.memory_space<vmem>>, vector<8x8xf32>
    tpu.vector_store %arg5[%c0_8, %c0_9], %6 {strides = array<i32>} : memref<8x8xf32, #tpu.memory_space<vmem>>, vector<8x8xf32>,
    return
  }
  func.func @transform_0(%arg0: i32) -> (i32, i32) {
    %c0_i32 = arith.constant 0 : i32
    %c0_i32_0 = arith.constant 0 : i32
    %c0_i32_1 = arith.constant 0 : i32
    return %c0_i32, %c0_i32_0 : i32, i32
  }
  func.func @transform_1(%arg0: i32) -> (i32, i32) {
    %c0_i32 = arith.constant 0 : i32
    %c0_i32_0 = arith.constant 0 : i32
    %c0_i32_1 = arith.constant 0 : i32
    return %c0_i32, %c0_i32_0 : i32, i32
  }
  func.func @transform_2(%arg0: i32) -> (i32, i32) {
    %c0_i32 = arith.constant 0 : i32
    %c0_i32_0 = arith.constant 0 : i32
    return %arg0, %c0_i32 : i32, i32
  }
  func.func @transform_3(%arg0: i32) -> (i32, i32) {
    %c0_i32 = arith.constant 0 : i32
    %c0_i32_0 = arith.constant 0 : i32
    return %arg0, %c0_i32 : i32, i32
  }
  func.func @transform_4(%arg0: i32) -> (i32, i32) {
    %c0_i32 = arith.constant 0 : i32
    %c0_i32_0 = arith.constant 0 : i32
    return %arg0, %c0_i32 : i32, i32
  }
}

</mosaic_0001>

<bundles_post_ra>
// kernel: tpu_custom_call.1
= control target key start
LH: loop header
LB: loop body
LE: loop exit
PB: predicated region body
PF: predicated region fallthrough
CT: control target
= control target key end

     0   :  { %vm26_vm0 = vcmask 1042432   ;;  %v238_v2 = vmov 0.0   ;;  %vm22_vm1 = vcmask 23552   ;;  %s290_s0 = inlined_call_operand.vmem [shape: f32[3,8], index: 0, kind: input, shape index: {}]   ;;  %s291_s1 = inlined_call_operand.vmem [shape: f32[3,8], index: 1, kind: input, shape index: {}]   ;;  %s292_s2 = inlined_call_operand.vmem [shape: f32[8,3], index: 2, kind: input, shape index: {}]   ;;  %s293_s3 = inlined_call_operand.vmem [shape: f32[8,3], index: 3, kind: input, shape index: {}]   ;;  %s294_s4 = inlined_call_operand.hbm [shape: f32[8,8], index: 4, kind: output, shape index: {}]  }
   0x1   :  { %v21_v0 = vld [vmem:[%s291_s1] sm:$0x7]  ;;  %200 = vmatprep.subr.mxu1 %v238_v2  ;;  %205 = vmatprep.subr.mxu0 %v238_v2 }
   0x2   :  { %v20_v1 = vld [vmem:[%s293_s3] sm:$0xff] }
   0x3   :  { %v19_v3 = vld [vmem:[%s290_s0] sm:$0x7] }
   0x4   :  { %v18_v4 = vld [vmem:[%s292_s2] sm:$0xff] }
   0x5   :  { %9 = vsyncpa [#allocation3], 0  ;;  %201 = vmatpush3.msk.msra.mxu1 %vm26_vm0, %v21_v0  ;;  %vm239_vm2 = vmmov 0   ;;  %206 = vmatpush3.msk.msra.mxu0 %vm26_vm0, %v19_v3  ;;  %s240_s1 = smov [#allocation2]   ;;  %vm176_vm3 = vcmask 64512  }
   0x6   :  { %202 = vmatprep.mubr.msk.f32.mxu1 %vm239_vm2, %v238_v2  ;;  %207 = vmatprep.mubr.msk.f32.mxu0 %vm239_vm2, %v238_v2  ;;  %s184_s3 = sshll.u32 %s240_s1, 4  ;;  %s185_s3 = int_to_ptr.vmem [resolvable:$true] %s184_s3 }
   0x7   :  { %203 = vmatmul.mubr.msk.f32.vlgmr.msra.gmra.mrb[0].mxu1 %vm22_vm1, %v20_v1  ;;  %208 = vmatmul.mubr.msk.f32.vlgmr.msra.gmra.mrb[0].mxu0 %vm22_vm1, %v18_v4  ;;  %s214_s0 = scalar_lea.vmem %s185_s3, 128  ;;  %p219_p1 = scmp.lt.s32.totalorder %s185_s3, %s185_s3 }
   0x8   :  { %p215_p0 = scmp.ne.s32.totalorder %s185_s3, %s214_s0  ;;  %p220_p2 = scmp.lt.s32.totalorder %s214_s0, %s214_s0 }
   0xa   :  { %p221_p3 = por %p220_p2, %p219_p1 }
   0xc   :  { %p222_p4 = pnand %p221_p3, %p215_p0 }
  0xda   :  { %v96_v5 = vpop.f32.mrb[0].mxu1  ;;  %v172_v6 = vpop.f32.mrb[0].mxu0 }
  0xdb   :  { %v173_v7 = vadd.f32 %v172_v6, %v96_v5  ;;  %v204_v8 = vpop.f32.mrb[1].mxu1  ;;  %v209_v9 = vpop.f32.mrb[1].mxu0 }
  0xdd   :  { %177 = vst.msk [vmem:[#allocation2] sm:$0xff] %vm176_vm3, %v173_v7 }
  0xde   :  { %225 = shalt.err (!%p222_p4)
}
  0xdf   :  { %s226_s24 = scalar_lea.hbm %s294_s4, 128 }
  0xe0   :  { %p227_p5 = scmp.ne.s32.totalorder %s294_s4, %s226_s24  ;;  %p230_p6 = scmp.lt.u32.totalorder %s226_s24, %s294_s4 }
  0xe2   :  { %p232_p7 = pnand %p230_p6, %p227_p5 }
  0xe4   :  { %235 = shalt.err (!%p232_p7)
}
  0xe5   :  { %187 = dma.vmem_to_hbm [thread:$0]  %s185_s3, 128, %s294_s4, [#allocation3]  }
  0xe6   :  { %236 = dma.done.wait [#allocation3], 128  }
  0xe7   :  { %237 = vsyncadd [#allocation3], 4294967168 }
  0xe8   :  { %191 = vsyncpa [#allocation3], 1 }

</bundles_post_ra>
